<compile_context>
chip_gen: v7x
topology: tpu7x:2x2x1
jax: 0.10.0
libtpu: 0.0.40
codegen_flags: <defaults>
</compile_context>

<pallas_src>
import jax
import jax.numpy as jnp
import numpy as np
from jax.experimental import pallas as pl
from jax.experimental.pallas import tpu as pltpu

# Timesteps per recurrence grid step.  Small here so the toy test exercises a
# multi-step grid; raise (16-64) at production T to amortize per-grid-step
# overhead while keeping chunk*B*3H (double-buffered) inside the VMEM budget.
T_CHUNK_CAP = 4


# ------------------------------- helpers ------------------------------------

def _round_up(x, m):
    return (x + m - 1) // m * m


def _pick_divisor(n, cap):
    best = 1
    for d in range(1, min(n, cap) + 1):
        if n % d == 0:
            best = d
    return best


def _pick_row_tile(rows, cap=512):
    """Largest multiple of 8 that divides `rows` and is <= cap."""
    best = min(rows, 8)
    d = 8
    while d <= min(rows, cap):
        if rows % d == 0:
            best = d
        d += 8
    return best


def _vmem_limit(*block_shapes, dtype_bytes=4):
    """Explicit VMEM budget: double-buffered blocks + slack, clamped so the
    same code stays under v7x's 64 MiB physical VMEM."""
    nbytes = sum(int(np.prod(s)) for s in block_shapes) * dtype_bytes
    return int(min(max(2 * nbytes + (4 << 20), 16 << 20), 48 << 20))


# ----------------------------- Pallas kernels ------------------------------

def _make_proj_kernel(n_in, n_out):
    """Row-tiled input projection: out_j = sum_i x_i @ W_ji + b_j."""
    def kernel(*refs):
        x_refs = refs[:n_in]
        w_refs = refs[n_in:n_in + n_in * n_out]
        b_refs = refs[n_in + n_in * n_out:n_in + n_in * n_out + n_out]
        o_refs = refs[n_in + n_in * n_out + n_out:]
        xs = [r[...] for r in x_refs]
        for j in range(n_out):
            acc = jnp.broadcast_to(b_refs[j][...], o_refs[j].shape)
            for i in range(n_in):
                acc = acc + jnp.dot(xs[i], w_refs[j * n_in + i][...],
                                    preferred_element_type=jnp.float32)
            o_refs[j][...] = acc
    return kernel


def gru_seq_kernel(lens_ref, gf_ref, gb_ref, whhf_ref, bhhnf_ref,
                   whhb_ref, bhhnb_ref, of_ref, ob_ref, hf_sc, hb_sc):
    """Fused fwd+bwd GRU recurrence over one chunk of timesteps.

    gf_ref/gb_ref: (chunk, B, 3H) precomputed x@W_ih + (b_ih + b_hh[r,z]),
                   gf in forward time order, gb block reversed via index_map.
    Hidden states are carried across grid steps in VMEM scratch.
    """
    t0 = pl.program_id(0)
    chunk = gf_ref.shape[0]
    T = pl.num_programs(0) * chunk
    H = whhf_ref.shape[0]
    B = of_ref.shape[1]

    @pl.when(t0 == 0)
    def _():
        hf_sc[...] = jnp.zeros_like(hf_sc)
        hb_sc[...] = jnp.zeros_like(hb_sc)

    lens = lens_ref[...]                      # (B, 1) int32
    whh_f = whhf_ref[...]
    whh_b = whhb_ref[...]
    # Hoist bias broadcasts out of the time loop (JAX does not CSE them).
    bhhn_f = jnp.broadcast_to(bhhnf_ref[...], (B, H))
    bhhn_b = jnp.broadcast_to(bhhnb_ref[...], (B, H))

    def cell(gx, h, whh, bhh_n):
        gh = jnp.dot(h, whh, preferred_element_type=jnp.float32)
        r = jax.nn.sigmoid(gx[:, 0:H] + gh[:, 0:H])
        z = jax.nn.sigmoid(gx[:, H:2 * H] + gh[:, H:2 * H])
        n = jnp.tanh(gx[:, 2 * H:3 * H] + r * (gh[:, 2 * H:3 * H] + bhh_n))
        return (1.0 - z) * n + z * h

    def body(k, carry):
        hf, hb = carry
        t = t0 * chunk + k                    # global forward timestep
        s = T - 1 - t                         # global backward timestep
        kb = chunk - 1 - k                    # local index of s in the bwd block
        hf_new = cell(gf_ref[k], hf, whh_f, bhhn_f)
        hb_new = cell(gb_ref[kb], hb, whh_b, bhhn_b)
        # packed-sequence semantics: freeze hidden on padded steps
        hf = jnp.where(lens > t, hf_new, hf)
        hb = jnp.where(lens > s, hb_new, hb)
        of_ref[k] = hf
        ob_ref[kb] = hb
        return hf, hb

    hf, hb = jax.lax.fori_loop(0, chunk, body, (hf_sc[...], hb_sc[...]),
                               unroll=True)
    hf_sc[...] = hf
    hb_sc[...] = hb


def gru_last_kernel(lens_ref, gb_ref, whh_ref, bhhn_ref, fcw_ref, fcb_ref,
                    o_ref, h_sc):
    """Last layer: backward direction only, FC head fused (written at t==T-1)."""
    t0 = pl.program_id(0)
    chunk = gb_ref.shape[0]
    Tc = pl.num_programs(0)
    T = Tc * chunk
    H = whh_ref.shape[0]
    B = o_ref.shape[0]

    @pl.when(t0 == 0)
    def _():
        h_sc[...] = jnp.zeros_like(h_sc)

    lens = lens_ref[...]
    whh = whh_ref[...]
    bhh_n = jnp.broadcast_to(bhhn_ref[...], (B, H))

    def body(k, h):
        t = t0 * chunk + k
        s = T - 1 - t
        kb = chunk - 1 - k
        gx = gb_ref[kb]
        gh = jnp.dot(h, whh, preferred_element_type=jnp.float32)
        r = jax.nn.sigmoid(gx[:, 0:H] + gh[:, 0:H])
        z = jax.nn.sigmoid(gx[:, H:2 * H] + gh[:, H:2 * H])
        n = jnp.tanh(gx[:, 2 * H:3 * H] + r * (gh[:, 2 * H:3 * H] + bhh_n))
        h_new = (1.0 - z) * n + z * h
        return jnp.where(lens > s, h_new, h)

    h = jax.lax.fori_loop(0, chunk, body, h_sc[...], unroll=True)
    h_sc[...] = h

    @pl.when(t0 == Tc - 1)
    def _():
        o_ref[...] = (jnp.dot(h, fcw_ref[...], preferred_element_type=jnp.float32)
                      + fcb_ref[...])


# ------------------------------- wrappers ----------------------------------

def _proj(xs, ws, bs):
    """Pipelined, row-tiled projection.  xs: list of (R, Din_i); ws[j][i]:
    (Din_i, G); bs: list of (1, G).  Returns a tuple of (R, G) outputs."""
    n_in, n_out = len(xs), len(bs)
    R = xs[0].shape[0]
    G = bs[0].shape[1]
    row_tile = _pick_row_tile(R)
    grid = (R // row_tile,)
    flat_ws = [ws[j][i] for j in range(n_out) for i in range(n_in)]

    in_specs = ([pl.BlockSpec((row_tile, x.shape[1]), lambda i: (i, 0)) for x in xs]
                + [pl.BlockSpec(w.shape, lambda i: (0, 0)) for w in flat_ws]
                + [pl.BlockSpec(b.shape, lambda i: (0, 0)) for b in bs])
    out_specs = [pl.BlockSpec((row_tile, G), lambda i: (i, 0)) for _ in range(n_out)]
    out_shape = [jax.ShapeDtypeStruct((R, G), jnp.float32) for _ in range(n_out)]

    limit = _vmem_limit(*([(row_tile, x.shape[1]) for x in xs]
                          + [w.shape for w in flat_ws]
                          + [b.shape for b in bs]
                          + [(row_tile, G)] * n_out))
    outs = pl.pallas_call(
        _make_proj_kernel(n_in, n_out),
        grid=grid,
        in_specs=in_specs,
        out_specs=out_specs,
        out_shape=out_shape,
        compiler_params=pltpu.CompilerParams(
            dimension_semantics=("parallel",), vmem_limit_bytes=limit),
    )(*xs, *flat_ws, *bs)
    return tuple(outs)


def _proj_inputs(layer_in, entry):
    """Flatten the layer input (single array or (hseq_f, hseq_b) pair) and pick
    the matching input-projection weights (no (T,B,2H) concat ever built)."""
    if isinstance(layer_in, tuple):
        xf, xb = layer_in
        T, B, Din = xf.shape
        xs = [xf.reshape(T * B, Din), xb.reshape(T * B, Din)]
        wrow = [entry["wih_top"], entry["wih_bot"]]
    else:
        T, B, Din = layer_in.shape
        xs = [layer_in.reshape(T * B, Din)]
        wrow = [entry["wih"]]
    return T, B, xs, wrow


def gru_bidir_layer(layer_in, lens_col, lpad):
    """One bidirectional GRU layer (all layers except the last)."""
    T, B, xs, wrow_f = _proj_inputs(layer_in, lpad["fwd"])
    _, _, _, wrow_b = _proj_inputs(layer_in, lpad["bwd"])
    gf, gb = _proj(xs, [wrow_f, wrow_b],
                   [lpad["fwd"]["bih_fold"], lpad["bwd"]["bih_fold"]])
    G = gf.shape[1]
    H = G // 3
    gf = gf.reshape(T, B, G)
    gb = gb.reshape(T, B, G)

    chunk = _pick_divisor(T, T_CHUNK_CAP)
    Tc = T // chunk
    limit = _vmem_limit((B, 1), (chunk, B, G), (chunk, B, G),
                        (H, G), (1, H), (H, G), (1, H),
                        (chunk, B, H), (chunk, B, H), (B, H), (B, H))
    out_f, out_b = pl.pallas_call(
        gru_seq_kernel,
        grid=(Tc,),
        in_specs=[
            pl.BlockSpec((B, 1), lambda i: (0, 0)),                  # lens
            pl.BlockSpec((chunk, B, G), lambda i: (i, 0, 0)),        # gates fwd
            pl.BlockSpec((chunk, B, G), lambda i: (Tc - 1 - i, 0, 0)),  # gates bwd
            pl.BlockSpec((H, G), lambda i: (0, 0)),                  # whh fwd
            pl.BlockSpec((1, H), lambda i: (0, 0)),                  # bhh_n fwd
            pl.BlockSpec((H, G), lambda i: (0, 0)),                  # whh bwd
            pl.BlockSpec((1, H), lambda i: (0, 0)),                  # bhh_n bwd
        ],
        out_specs=[pl.BlockSpec((chunk, B, H), lambda i: (i, 0, 0)),
                   pl.BlockSpec((chunk, B, H), lambda i: (Tc - 1 - i, 0, 0))],
        out_shape=[jax.ShapeDtypeStruct((T, B, H), jnp.float32),
                   jax.ShapeDtypeStruct((T, B, H), jnp.float32)],
        scratch_shapes=[pltpu.VMEM((B, H), jnp.float32),
                        pltpu.VMEM((B, H), jnp.float32)],
        compiler_params=pltpu.CompilerParams(
            dimension_semantics=("arbitrary",), vmem_limit_bytes=limit),
    )(lens_col, gf, gb, lpad["fwd"]["whh"], lpad["fwd"]["bhh_n"],
      lpad["bwd"]["whh"], lpad["bwd"]["bhh_n"])
    return out_f, out_b


def gru_last_layer_logits(layer_in, lens_col, lpad_bwd, fc_w, fc_b):
    """Last layer: backward direction only + fused FC head."""
    T, B, xs, wrow = _proj_inputs(layer_in, lpad_bwd)
    (gb,) = _proj(xs, [wrow], [lpad_bwd["bih_fold"]])
    G = gb.shape[1]
    H = G // 3
    O = fc_w.shape[1]
    gb = gb.reshape(T, B, G)

    chunk = _pick_divisor(T, T_CHUNK_CAP)
    Tc = T // chunk
    limit = _vmem_limit((B, 1), (chunk, B, G), (H, G), (1, H),
                        (H, O), (1, O), (B, O), (B, H))
    return pl.pallas_call(
        gru_last_kernel,
        grid=(Tc,),
        in_specs=[
            pl.BlockSpec((B, 1), lambda i: (0, 0)),
            pl.BlockSpec((chunk, B, G), lambda i: (Tc - 1 - i, 0, 0)),
            pl.BlockSpec((H, G), lambda i: (0, 0)),
            pl.BlockSpec((1, H), lambda i: (0, 0)),
            pl.BlockSpec((H, O), lambda i: (0, 0)),
            pl.BlockSpec((1, O), lambda i: (0, 0)),
        ],
        out_specs=pl.BlockSpec((B, O), lambda i: (0, 0)),
        out_shape=jax.ShapeDtypeStruct((B, O), jnp.float32),
        scratch_shapes=[pltpu.VMEM((B, H), jnp.float32)],
        compiler_params=pltpu.CompilerParams(
            dimension_semantics=("arbitrary",), vmem_limit_bytes=limit),
    )(lens_col, gb, lpad_bwd["whh"], lpad_bwd["bhh_n"], fc_w, fc_b)


# ---------------------- parameter padding (lane/sublane) --------------------

def _pad_gate_mat(w, rows_pad, H, H_pad):
    """(rows, 3H) -> (rows_pad, 3*H_pad), zero-padding each gate block so the
    r/z/n column slices stay 128-lane aligned.  Zero padding is exactly
    neutral: padded hidden columns stay 0 through the recurrence."""
    rows = w.shape[0]
    w3 = w.reshape(rows, 3, H)
    w3 = jnp.pad(w3, ((0, rows_pad - rows), (0, 0), (0, H_pad - H)))
    return w3.reshape(rows_pad, 3 * H_pad)


def _pad_params(params, H_pad, O_pad):
    H = params["gru"][0]["fwd"]["whh"].shape[0]
    O = params["fc_w"].shape[1]
    padded = {
        "embedding": jnp.pad(params["embedding"], ((0, 0), (0, H_pad - H))),
        "fc_w": jnp.pad(params["fc_w"], ((0, H_pad - H), (0, O_pad - O))),
        "fc_b": jnp.pad(params["fc_b"], ((0, 0), (0, O_pad - O))),
        "gru": [],
    }
    for li, lp in enumerate(params["gru"]):
        lpad = {}
        for d in ("fwd", "bwd"):
            p = lp[d]
            whh_p = _pad_gate_mat(p["whh"], H_pad, H, H_pad)
            bih_p = _pad_gate_mat(p["bih"], 1, H, H_pad)
            bhh_p = _pad_gate_mat(p["bhh"], 1, H, H_pad)
            # Fold b_hh for r/z into the precomputed gate bias; only b_hh_n
            # must stay inside the recurrence (r * (Whh_n h + b_hh_n)).
            bih_fold = bih_p.at[:, :2 * H_pad].add(bhh_p[:, :2 * H_pad])
            bhh_n = bhh_p[:, 2 * H_pad:]
            entry = {"whh": whh_p, "bih_fold": bih_fold, "bhh_n": bhh_n}
            if li == 0:
                entry["wih"] = _pad_gate_mat(p["wih"], H_pad, H, H_pad)
            else:
                entry["wih_top"] = _pad_gate_mat(p["wih"][:H], H_pad, H, H_pad)
                entry["wih_bot"] = _pad_gate_mat(p["wih"][H:], H_pad, H, H_pad)
            lpad[d] = entry
        padded["gru"].append(lpad)
    return padded


# ------------------------------ forward pass --------------------------------

def rnn_classifier_forward(params, tokens, seq_lengths):
    """tokens: (B, T) int32, seq_lengths: (B,) int32 (sorted descending)."""
    B, T = tokens.shape
    H = params["gru"][0]["fwd"]["whh"].shape[0]
    O = params["fc_w"].shape[1]
    B_pad = _round_up(max(B, 8), 8)
    H_pad = _round_up(H, 128)
    O_pad = _round_up(O, 128)

    padded = _pad_params(params, H_pad, O_pad)

    tokens_p = jnp.pad(tokens.astype(jnp.int32), ((0, B_pad - B), (0, 0)))
    lens_p = jnp.pad(seq_lengths.astype(jnp.int32), (0, B_pad - B))
    lens_col = lens_p.reshape(B_pad, 1)

    # Gather directly time-major (avoids a full (T,B,H) transpose pass).
    # TODO(synk): embedding gather kept in XLA (jnp.take); a Pallas
    # scalar-prefetch row gather could fuse it with the first projection.
    x = jnp.take(padded["embedding"], tokens_p.T, axis=0).astype(jnp.float32)

    layer_in = x
    n_layers = len(params["gru"])
    for li in range(n_layers - 1):
        layer_in = gru_bidir_layer(layer_in, lens_col, padded["gru"][li])
    # For a bidirectional GRU, hidden[-1] == last layer's backward final hidden.
    logits_p = gru_last_layer_logits(layer_in, lens_col,
                                     padded["gru"][n_layers - 1]["bwd"],
                                     padded["fc_w"], padded["fc_b"])
    return logits_p[:B, :O]


# --------------------------- pure-JAX reference -----------------------------

def _gru_direction_ref(x, mask, wih, whh, bih, bhh, reverse):
    H = whh.shape[0]

    def step(h, inp):
        xt, mt = inp
        gx = xt @ wih + bih
        gh = h @ whh + bhh
        r = jax.nn.sigmoid(gx[:, :H] + gh[:, :H])
        z = jax.nn.sigmoid(gx[:, H:2 * H] + gh[:, H:2 * H])
        n = jnp.tanh(gx[:, 2 * H:] + r * gh[:, 2 * H:])
        h_new = (1.0 - z) * n + z * h
        h_next = mt * h_new + (1.0 - mt) * h
        return h_next, h_next

    xs = (x[::-1], mask[::-1]) if reverse else (x, mask)
    h0 = jnp.zeros((x.shape[1], H), jnp.float32)
    hfin, hseq = jax.lax.scan(step, h0, xs)
    if reverse:
        hseq = hseq[::-1]
    return hseq, hfin


def rnn_classifier_forward_ref(params, tokens, seq_lengths):
    B, T = tokens.shape
    emb = jnp.take(params["embedding"], tokens, axis=0)
    x = jnp.transpose(emb, (1, 0, 2)).astype(jnp.float32)
    mask = (jnp.arange(T)[:, None] < seq_lengths[None, :]).astype(jnp.float32)[..., None]
    layer_in = x
    h_last_bwd = None
    for lp in params["gru"]:
        hseq_f, _ = _gru_direction_ref(layer_in, mask, lp["fwd"]["wih"], lp["fwd"]["whh"],
                                       lp["fwd"]["bih"], lp["fwd"]["bhh"], False)
        hseq_b, hfin_b = _gru_direction_ref(layer_in, mask, lp["bwd"]["wih"], lp["bwd"]["whh"],
                                            lp["bwd"]["bih"], lp["bwd"]["bhh"], True)
        layer_in = jnp.concatenate([hseq_f, hseq_b], axis=-1)
        h_last_bwd = hfin_b
    return h_last_bwd @ params["fc_w"] + params["fc_b"]


# ------------------------------ param init ----------------------------------

def init_params(key, vocab_size, hidden_size, output_size, n_layers):
    keys = iter(jax.random.split(key, 4 + n_layers * 2 * 4))
    scale = 1.0 / np.sqrt(hidden_size)

    def u(k, shape):
        return jax.random.uniform(k, shape, jnp.float32, -scale, scale)

    params = {
        "embedding": u(next(keys), (vocab_size, hidden_size)),
        "gru": [],
        "fc_w": u(next(keys), (hidden_size, output_size)),
        "fc_b": u(next(keys), (1, output_size)),
    }
    for layer in range(n_layers):
        d_in = hidden_size if layer == 0 else 2 * hidden_size
        layer_p = {}
        for direction in ("fwd", "bwd"):
            layer_p[direction] = {
                "wih": u(next(keys), (d_in, 3 * hidden_size)),   # gates r|z|n
                "whh": u(next(keys), (hidden_size, 3 * hidden_size)),
                "bih": u(next(keys), (1, 3 * hidden_size)),
                "bhh": u(next(keys), (1, 3 * hidden_size)),
            }
        params["gru"].append(layer_p)
    return params


# --------------------------------- main --------------------------------------

if __name__ == "__main__":
    VOCAB, HIDDEN, OUTPUT, N_LAYERS = 64, 32, 10, 2
    B, T = 4, 8

    key = jax.random.PRNGKey(0)
    k_param, k_tok = jax.random.split(key)
    params = init_params(k_param, VOCAB, HIDDEN, OUTPUT, N_LAYERS)

    tokens = jax.random.randint(k_tok, (B, T), 0, VOCAB, dtype=jnp.int32)
    # pack_padded_sequence (enforce_sorted=True) requires descending lengths.
    seq_lengths = jnp.array([8, 7, 5, 3], dtype=jnp.int32)

    out = rnn_classifier_forward(params, tokens, seq_lengths)
    out = jax.block_until_ready(out)

    ref = jax.block_until_ready(rnn_classifier_forward_ref(params, tokens, seq_lengths))
    np.testing.assert_allclose(np.asarray(out), np.asarray(ref), rtol=1e-4, atol=1e-4)

    assert out.shape == (B, OUTPUT)
    print("KERNEL_OK")
</pallas_src>

<mosaic_0001>
module attributes {stable_mosaic.version = 11 : i64} {
  func.func @kernel(%arg0: i32, %arg1: memref<64x128xf32, #tpu.memory_space<vmem>>, %arg2: memref<128x384xf32, #tpu.memory_space<vmem>>, %arg3: memref<128x384xf32, #tpu.memory_space<vmem>>, %arg4: memref<1x384xf32, #tpu.memory_space<vmem>>, %arg5: memref<1x384xf32, #tpu.memory_space<vmem>>, %arg6: memref<64x384xf32, #tpu.memory_space<vmem>>, %arg7: memref<64x384xf32, #tpu.memory_space<vmem>>) attributes {dimension_semantics = [#tpu.dimension_semantics<parallel>], iteration_bounds = array<i64: 1>, scalar_prefetch = 0 : i64, scratch_operands = 0 : i64, tpu.core_type = #tpu.core_type<tc>, window_params = [{transform_indices = @transform_0, window_bounds = array<i64: 64, 128>}, {pipeline_mode = #tpu.pipeline_mode<synchronous>, transform_indices = @transform_1, window_bounds = array<i64: 128, 384>}, {pipeline_mode = #tpu.pipeline_mode<synchronous>, transform_indices = @transform_2, window_bounds = array<i64: 128, 384>}, {pipeline_mode = #tpu.pipeline_mode<synchronous>, transform_indices = @transform_3, window_bounds = array<i64: 1, 384>}, {pipeline_mode = #tpu.pipeline_mode<synchronous>, transform_indices = @transform_4, window_bounds = array<i64: 1, 384>}, {transform_indices = @transform_5, window_bounds = array<i64: 64, 384>}, {transform_indices = @transform_6, window_bounds = array<i64: 64, 384>}]} {
    %c0 = arith.constant 0 : index
    %c0_0 = arith.constant 0 : index
    %0 = vector.load %arg1[%c0, %c0_0] : memref<64x128xf32, #tpu.memory_space<vmem>>, vector<64x128xf32>
    %c0_1 = arith.constant 0 : index
    %c0_2 = arith.constant 0 : index
    %1 = vector.load %arg4[%c0_1, %c0_2] : memref<1x384xf32, #tpu.memory_space<vmem>>, vector<1x384xf32>
    %2 = vector.shape_cast %1 : vector<1x384xf32> to vector<1x384xf32>
    %3 = vector.broadcast %2 : vector<1x384xf32> to vector<64x384xf32>
    %c0_3 = arith.constant 0 : index
    %c0_4 = arith.constant 0 : index
    %4 = vector.load %arg2[%c0_3, %c0_4] : memref<128x384xf32, #tpu.memory_space<vmem>>, vector<128x384xf32>
    %cst = arith.constant dense<0.000000e+00> : vector<64x384xf32>
    %5 = tpu.matmul %0, %4, %cst {dimension_numbers = #tpu.dot_dimension_numbers<[1], [0], [0], [1], [0, 0, 1, 1], [], []>} : vector<64x128xf32>, vector<128x384xf32>, vector<64x384xf32> -> vector<64x384xf32>
    %6 = arith.addf %3, %5 : vector<64x384xf32>
    %c0_5 = arith.constant 0 : index
    %c0_6 = arith.constant 0 : index
    %7 = vector.load %arg6[%c0_5, %c0_6] : memref<64x384xf32, #tpu.memory_space<vmem>>, vector<64x384xf32>
    tpu.vector_store %arg6[%c0_5, %c0_6], %6 {strides = array<i32>} : memref<64x384xf32, #tpu.memory_space<vmem>>, vector<64x384xf32>,
    %c0_7 = arith.constant 0 : index
    %c0_8 = arith.constant 0 : index
    %8 = vector.load %arg5[%c0_7, %c0_8] : memref<1x384xf32, #tpu.memory_space<vmem>>, vector<1x384xf32>
    %9 = vector.shape_cast %8 : vector<1x384xf32> to vector<1x384xf32>
    %10 = vector.broadcast %9 : vector<1x384xf32> to vector<64x384xf32>
    %c0_9 = arith.constant 0 : index
    %c0_10 = arith.constant 0 : index
    %11 = vector.load %arg3[%c0_9, %c0_10] : memref<128x384xf32, #tpu.memory_space<vmem>>, vector<128x384xf32>
    %cst_11 = arith.constant dense<0.000000e+00> : vector<64x384xf32>
    %12 = tpu.matmul %0, %11, %cst_11 {dimension_numbers = #tpu.dot_dimension_numbers<[1], [0], [0], [1], [0, 0, 1, 1], [], []>} : vector<64x128xf32>, vector<128x384xf32>, vector<64x384xf32> -> vector<64x384xf32>
    %13 = arith.addf %10, %12 : vector<64x384xf32>
    %c0_12 = arith.constant 0 : index
    %c0_13 = arith.constant 0 : index
    %14 = vector.load %arg7[%c0_12, %c0_13] : memref<64x384xf32, #tpu.memory_space<vmem>>, vector<64x384xf32>
    tpu.vector_store %arg7[%c0_12, %c0_13], %13 {strides = array<i32>} : memref<64x384xf32, #tpu.memory_space<vmem>>, vector<64x384xf32>,
    return
  }
  func.func @transform_0(%arg0: i32) -> (i32, i32) {
    %c0_i32 = arith.constant 0 : i32
    %c0_i32_0 = arith.constant 0 : i32
    return %arg0, %c0_i32 : i32, i32
  }
  func.func @transform_1(%arg0: i32) -> (i32, i32) {
    %c0_i32 = arith.constant 0 : i32
    %c0_i32_0 = arith.constant 0 : i32
    %c0_i32_1 = arith.constant 0 : i32
    return %c0_i32, %c0_i32_0 : i32, i32
  }
  func.func @transform_2(%arg0: i32) -> (i32, i32) {
    %c0_i32 = arith.constant 0 : i32
    %c0_i32_0 = arith.constant 0 : i32
    %c0_i32_1 = arith.constant 0 : i32
    return %c0_i32, %c0_i32_0 : i32, i32
  }
  func.func @transform_3(%arg0: i32) -> (i32, i32) {
    %c0_i32 = arith.constant 0 : i32
    %c0_i32_0 = arith.constant 0 : i32
    %c0_i32_1 = arith.constant 0 : i32
    return %c0_i32, %c0_i32_0 : i32, i32
  }
  func.func @transform_4(%arg0: i32) -> (i32, i32) {
    %c0_i32 = arith.constant 0 : i32
    %c0_i32_0 = arith.constant 0 : i32
    %c0_i32_1 = arith.constant 0 : i32
    return %c0_i32, %c0_i32_0 : i32, i32
  }
  func.func @transform_5(%arg0: i32) -> (i32, i32) {
    %c0_i32 = arith.constant 0 : i32
    %c0_i32_0 = arith.constant 0 : i32
    return %arg0, %c0_i32 : i32, i32
  }
  func.func @transform_6(%arg0: i32) -> (i32, i32) {
    %c0_i32 = arith.constant 0 : i32
    %c0_i32_0 = arith.constant 0 : i32
    return %arg0, %c0_i32 : i32, i32
  }
}

</mosaic_0001>

<bundles_post_ra>
// kernel: tpu_custom_call.1
= control target key start
LH: loop header
LB: loop body
LE: loop exit
PB: predicated region body
PF: predicated region fallthrough
CT: control target
= control target key end

     0   :  { %12 = vsyncpa [#allocation3], 0  ;;  %s1405_s0 = inlined_call_operand.hbm [shape: f32[64,128], index: 0, kind: input, shape index: {}]   ;;  %s1406_s1 = inlined_call_operand.hbm [shape: f32[128,384], index: 1, kind: input, shape index: {}]   ;;  %s1407_s2 = inlined_call_operand.hbm [shape: f32[128,384], index: 2, kind: input, shape index: {}]   ;;  %s1408_s3 = inlined_call_operand.vmem [shape: f32[1,384], index: 3, kind: input, shape index: {}]   ;;  %s1409_s4 = inlined_call_operand.vmem [shape: f32[1,384], index: 4, kind: input, shape index: {}]   ;;  %s1410_s5 = inlined_call_operand.hbm [shape: f32[64,384], index: 5, kind: output, shape index: {0}]   ;;  %s1411_s6 = inlined_call_operand.hbm [shape: f32[64,384], index: 6, kind: output, shape index: {1}]  }
   0x1   :  { %13 = vsyncpa [#allocation6], 0 }
   0x2   :  { %14 = vsyncpa [#allocation4], 0 }
   0x3   :  { %15 = vsyncpa [#allocation10], 0  ;;  %s1161_s21 = smov [#allocation5]   ;;  %s1043_s25 = scalar_lea.hbm %s1406_s1, 6144 }
   0x4   :  { %s33_s22 = sshll.u32 %s1161_s21, 4  ;;  %p1044_p0 = scmp.ne.s32.totalorder %s1406_s1, %s1043_s25  ;;  %s34_s22 = int_to_ptr.vmem [resolvable:$true] %s33_s22 }
   0x5   :  { %p1047_p1 = scmp.lt.u32.totalorder %s1043_s25, %s1406_s1 }
   0x7   :  { %p1049_p2 = pnand %p1047_p1, %p1044_p0 }
   0x9   :  { %1052 = shalt.err (!%p1049_p2)
}
   0xa   :  { %s1053_s30 = scalar_lea.vmem %s34_s22, 6144  ;;  %p1058_p4 = scmp.lt.s32.totalorder %s34_s22, %s34_s22 }
   0xb   :  { %p1054_p3 = scmp.ne.s32.totalorder %s34_s22, %s1053_s30  ;;  %p1059_p5 = scmp.lt.s32.totalorder %s1053_s30, %s1053_s30 }
   0xd   :  { %p1060_p6 = por %p1059_p5, %p1058_p4 }
   0xf   :  { %p1061_p7 = pnand %p1060_p6, %p1054_p3 }
  0x11   :  { %1064 = shalt.err (!%p1061_p7)
}
  0x12   :  { %s1162_s7 = smov 384   ;;  %s1163_s8 = smov 24  }
  0x13   :  { %39 = dma.hbm_to_vmem [thread:$0]  %s1406_s1, 6144, %s34_s22, [#allocation6], %s1162_s7, %s1162_s7, %s1163_s8  }
  0x14   :  { %s1164_s11 = smov [#allocation2]   ;;  %s1065_s15 = scalar_lea.hbm %s1405_s0, 1024 }
  0x15   :  { %s21_s12 = sshll.u32 %s1164_s11, 4  ;;  %p1066_p8 = scmp.ne.s32.totalorder %s1405_s0, %s1065_s15  ;;  %s22_s12 = int_to_ptr.vmem [resolvable:$true] %s21_s12 }
  0x16   :  { %p1069_p9 = scmp.lt.u32.totalorder %s1065_s15, %s1405_s0 }
  0x18   :  { %p1071_p10 = pnand %p1069_p9, %p1066_p8 }
  0x1a   :  { %1074 = shalt.err (!%p1071_p10)
}
  0x1b   :  { %s1075_s20 = scalar_lea.vmem %s22_s12, 1024  ;;  %p1080_p12 = scmp.lt.s32.totalorder %s22_s12, %s22_s12 }
  0x1c   :  { %p1076_p11 = scmp.ne.s32.totalorder %s22_s12, %s1075_s20  ;;  %p1081_p13 = scmp.lt.s32.totalorder %s1075_s20, %s1075_s20 }
  0x1e   :  { %p1082_p0 = por %p1081_p13, %p1080_p12 }
  0x20   :  { %p1083_p1 = pnand %p1082_p0, %p1076_p11 }
  0x22   :  { %1086 = shalt.err (!%p1083_p1)
}
  0x23   :  { %s1165_s1 = smov 128   ;;  %s1166_s21 = smov 8  }
  0x24   :  { %27 = dma.hbm_to_vmem [thread:$0]  %s1405_s0, 1024, %s22_s12, [#allocation3], %s1165_s1, %s1165_s1, %s1166_s21  }
  0x25   :  { %s1167_s24 = smov [#allocation7]   ;;  %s1087_s28 = scalar_lea.hbm %s1407_s2, 6144 }
  0x26   :  { %s45_s25 = sshll.u32 %s1167_s24, 4  ;;  %p1088_p2 = scmp.ne.s32.totalorder %s1407_s2, %s1087_s28  ;;  %s46_s25 = int_to_ptr.vmem [resolvable:$true] %s45_s25 }
  0x27   :  { %p1091_p3 = scmp.lt.u32.totalorder %s1087_s28, %s1407_s2 }
  0x29   :  { %p1093_p4 = pnand %p1091_p3, %p1088_p2 }
  0x2b   :  { %1096 = shalt.err (!%p1093_p4)
}
  0x2c   :  { %s1097_s11 = scalar_lea.vmem %s46_s25, 6144  ;;  %p1102_p6 = scmp.lt.s32.totalorder %s46_s25, %s46_s25 }
  0x2d   :  { %p1098_p5 = scmp.ne.s32.totalorder %s46_s25, %s1097_s11  ;;  %p1103_p7 = scmp.lt.s32.totalorder %s1097_s11, %s1097_s11 }
  0x2f   :  { %p1104_p8 = por %p1103_p7, %p1102_p6 }
  0x31   :  { %p1105_p9 = pnand %p1104_p8, %p1098_p5 }
  0x33   :  { %1108 = shalt.err (!%p1105_p9)
}
  0x34   :  { %51 = dma.hbm_to_vmem [thread:$0]  %s1407_s2, 6144, %s46_s25, [#allocation6], %s1162_s7, %s1162_s7, %s1163_s8  }
  0x35   :  { %1153 = dma.done.wait [#allocation3], 1024  }
  0x36   :  { %1154 = vsyncadd [#allocation3], 4294966272 }
  0x37   :  { %1155 = dma.done.wait [#allocation6], 12288  }
  0x38   :  { %1156 = vsyncadd [#allocation6], 4294955008  ;;  %v1168_v0 = vmov 0.0   ;;  %v91_v1 = vld [vmem:[#allocation5 + $0x8] sm:$0xff]  ;;  %v94_v2 = vld [vmem:[#allocation5 + $0x20] sm:$0xff]  ;;  %s1169_s15 = smov [#allocation8]  }
  0x39   :  { %202 = vmatprep.mubr.f32.mxu0 %v1168_v0  ;;  %v90_v3 = vld [vmem:[#allocation5] sm:$0xff]  ;;  %v905_v4 = vpack.c.bf16 %v94_v2, %v91_v1  ;;  %v93_v5 = vld [vmem:[#allocation5 + $0x18] sm:$0xff]  ;;  %v100_v7 = vld [vmem:[#allocation5 + $0x50] sm:$0xff]  ;;  %s740_s16 = sshll.u32 %s1169_s15, 4  ;;  %s741_s16 = int_to_ptr.vmem [resolvable:$true] %s740_s16 }
  0x3a   :  { %v97_v6 = vld [vmem:[#allocation5 + $0x38] sm:$0xff]  ;;  %v907_v8 = vpack.c.bf16 %v93_v5, %v90_v3  ;;  %v96_v10 = vld [vmem:[#allocation5 + $0x30] sm:$0xff]  ;;  %v99_v11 = vld [vmem:[#allocation5 + $0x48] sm:$0xff]  ;;  %p1114_p11 = scmp.lt.s32.totalorder %s741_s16, %s741_s16 }
  0x3b   :  { %v909_v9 = vpack.c.bf16 %v100_v7, %v97_v6  ;;  %v103_v12 = vld [vmem:[#allocation5 + $0x68] sm:$0xff]  ;;  %906 = vmatprep.subr.bf16.mxu0 %v905_v4  ;;  %v106_v13 = vld [vmem:[#allocation5 + $0x80] sm:$0xff]  ;;  %v911_v14 = vpack.c.bf16 %v99_v11, %v96_v10  ;;  %v105_v17 = vld [vmem:[#allocation5 + $0x78] sm:$0xff] }
  0x3c   :  { %908 = vmatpush1.bf16.msra.mxu0 %v907_v8  ;;  %v913_v15 = vpack.c.bf16 %v106_v13, %v103_v12  ;;  %v102_v16 = vld [vmem:[#allocation5 + $0x60] sm:$0xff]  ;;  %v109_v18 = vld [vmem:[#allocation5 + $0x98] sm:$0xff]  ;;  %v112_v19 = vld [vmem:[#allocation5 + $0xb0] sm:$0xff] }
  0x3d   :  { %910 = vmatprep.subr.bf16.mxu0 %v909_v9  ;;  %v92_v20 = vld [vmem:[#allocation5 + $0x10] sm:$0xff]  ;;  %v95_v21 = vld [vmem:[#allocation5 + $0x28] sm:$0xff]  ;;  %v915_v23 = vpack.c.bf16 %v105_v17, %v102_v16  ;;  %v98_v24 = vld [vmem:[#allocation5 + $0x40] sm:$0xff]  ;;  %v917_v26 = vpack.c.bf16 %v112_v19, %v109_v18 }
  0x3e   :  { %v937_v22 = vpack.c.bf16 %v95_v21, %v92_v20  ;;  %v101_v25 = vld [vmem:[#allocation5 + $0x58] sm:$0xff]  ;;  %v108_v27 = vld [vmem:[#allocation5 + $0x90] sm:$0xff]  ;;  %v111_v28 = vld [vmem:[#allocation5 + $0xa8] sm:$0xff] }
  0x3f   :  { %v115_v29 = vld [vmem:[#allocation5 + $0xc8] sm:$0xff]  ;;  %v941_v30 = vpack.c.bf16 %v101_v25, %v98_v24  ;;  %v118_v31 = vld [vmem:[#allocation5 + $0xe0] sm:$0xff]  ;;  %v104_v32 = vld [vmem:[#allocation5 + $0x70] sm:$0xff]  ;;  %v919_v35 = vpack.c.bf16 %v111_v28, %v108_v27 }
  0x40   :  { %912 = vmatpush1.bf16.msra.mxu0 %v911_v14  ;;  %938 = vmatprep.subr.bf16.mxu1 %v937_v22  ;;  %v107_v33 = vld [vmem:[#allocation5 + $0x88] sm:$0xff]  ;;  %v110_v36 = vld [vmem:[#allocation5 + $0xa0] sm:$0xff]  ;;  %v113_v37 = vld [vmem:[#allocation5 + $0xb8] sm:$0xff]  ;;  %v921_v38 = vpack.c.bf16 %v118_v31, %v115_v29 }
  0x41   :  { %914 = vmatprep.subr.bf16.mxu0 %v913_v15  ;;  %940 = vmatpush3.bf16.msra.mxu1 %v937_v22  ;;  %v945_v34 = vpack.c.bf16 %v107_v33, %v104_v32  ;;  %v114_v39 = vld [vmem:[#allocation5 + $0xc0] sm:$0xff]  ;;  %v117_v40 = vld [vmem:[#allocation5 + $0xd8] sm:$0xff]  ;;  %v124_v43 = vld [vmem:[#allocation5 + $0x110] sm:$0xff]  ;;  %v949_v44 = vpack.c.bf16 %v113_v37, %v110_v36 }
  0x42   :  { %942 = vmatprep.subr.bf16.mxu1 %v941_v30  ;;  %v1249_v41 = vld [vmem:[#allocation2] sm:$0xff]  ;;  %v121_v42 = vld [vmem:[#allocation5 + $0xf8] sm:$0xff]  ;;  %v923_v45 = vpack.c.bf16 %v117_v40, %v114_v39  ;;  %v116_v46 = vld [vmem:[#allocation5 + $0xd0] sm:$0xff] }
  0x43   :  { %849 = vmatprep.mubr.f32.mxu1 %v1249_v41  ;;  %v119_v47 = vld [vmem:[#allocation5 + $0xe8] sm:$0xff]  ;;  %v925_v48 = vpack.c.bf16 %v124_v43, %v121_v42  ;;  %v120_v49 = vld [vmem:[#allocation5 + $0xf0] sm:$0xff]  ;;  %v130_v52 = vld [vmem:[#allocation5 + $0x140] sm:$0xff] }
  0x44   :  { %916 = vmatpush1.bf16.msra.mxu0 %v915_v23  ;;  %v123_v50 = vld [vmem:[#allocation5 + $0x108] sm:$0xff]  ;;  %v953_v53 = vpack.c.bf16 %v119_v47, %v116_v46  ;;  %v122_v55 = vld [vmem:[#allocation5 + $0x100] sm:$0xff]  ;;  %v125_v56 = vld [vmem:[#allocation5 + $0x118] sm:$0xff] }
  0x45   :  { %918 = vmatprep.subr.bf16.mxu0 %v917_v26  ;;  %944 = vmatpush3.bf16.msra.mxu1 %v941_v30  ;;  %v127_v51 = vld [vmem:[#allocation5 + $0x128] sm:$0xff]  ;;  %v927_v54 = vpack.c.bf16 %v123_v50, %v120_v49  ;;  %v126_v58 = vld [vmem:[#allocation5 + $0x120] sm:$0xff]  ;;  %v129_v59 = vld [vmem:[#allocation5 + $0x138] sm:$0xff]  ;;  %v957_v62 = vpack.c.bf16 %v125_v56, %v122_v55 }
  0x46   :  { %946 = vmatprep.subr.bf16.mxu1 %v945_v34  ;;  %v929_v57 = vpack.c.bf16 %v130_v52, %v127_v51  ;;  %v133_v60 = vld [vmem:[#allocation5 + $0x158] sm:$0xff]  ;;  %v136_v61 = vld [vmem:[#allocation5 + $0x170] sm:$0xff]  ;;  %v931_v63 = vpack.c.bf16 %v129_v59, %v126_v58  ;;  %v131_v2 = vld [vmem:[#allocation5 + $0x148] sm:$0xff] }
  0x47   :  { %v128_v1 = vld [vmem:[#allocation5 + $0x130] sm:$0xff]  ;;  %v933_v3 = vpack.c.bf16 %v136_v61, %v133_v60  ;;  %v135_v5 = vld [vmem:[#allocation5 + $0x168] sm:$0xff]  ;;  %v425_v7 = vld [vmem:[#allocation7 + $0x20] sm:$0xff] }
  0x48   :  { %920 = vmatpush1.bf16.msra.mxu0 %v919_v35  ;;  %v132_v4 = vld [vmem:[#allocation5 + $0x150] sm:$0xff]  ;;  %v422_v6 = vld [vmem:[#allocation7 + $0x8] sm:$0xff]  ;;  %v961_v8 = vpack.c.bf16 %v131_v2, %v128_v1  ;;  %v134_v10 = vld [vmem:[#allocation5 + $0x160] sm:$0xff] }
  0x49   :  { %922 = vmatprep.subr.bf16.mxu0 %v921_v38  ;;  %948 = vmatpush3.bf16.msra.mxu1 %v945_v34  ;;  %v935_v9 = vpack.c.bf16 %v135_v5, %v132_v4  ;;  %v137_v11 = vld [vmem:[#allocation5 + $0x178] sm:$0xff]  ;;  %v969_v12 = vpack.c.bf16 %v425_v7, %v422_v6  ;;  %v421_v13 = vld [vmem:[#allocation7] sm:$0xff]  ;;  %v431_v16 = vld [vmem:[#allocation7 + $0x50] sm:$0xff] }
  0x4a   :  { %950 = vmatprep.subr.bf16.mxu1 %v949_v44  ;;  %v424_v14 = vld [vmem:[#allocation7 + $0x18] sm:$0xff]  ;;  %v965_v17 = vpack.c.bf16 %v137_v11, %v134_v10  ;;  %v423_v19 = vld [vmem:[#allocation7 + $0x10] sm:$0xff]  ;;  %v426_v20 = vld [vmem:[#allocation7 + $0x28] sm:$0xff] }
  0x4b   :  { %v428_v15 = vld [vmem:[#allocation7 + $0x38] sm:$0xff]  ;;  %v971_v18 = vpack.c.bf16 %v424_v14, %v421_v13  ;;  %v427_v22 = vld [vmem:[#allocation7 + $0x30] sm:$0xff]  ;;  %v430_v23 = vld [vmem:[#allocation7 + $0x48] sm:$0xff]  ;;  %v1001_v26 = vpack.c.bf16 %v426_v20, %v423_v19 }
  0x4c   :  { %924 = vmatpush1.bf16.msra.mxu0 %v923_v45  ;;  %v973_v21 = vpack.c.bf16 %v431_v16, %v428_v15  ;;  %v434_v24 = vld [vmem:[#allocation7 + $0x68] sm:$0xff]  ;;  %v437_v25 = vld [vmem:[#allocation7 + $0x80] sm:$0xff]  ;;  %v975_v28 = vpack.c.bf16 %v430_v23, %v427_v22  ;;  %v432_v30 = vld [vmem:[#allocation7 + $0x58] sm:$0xff] }
  0x4d   :  { %926 = vmatprep.subr.bf16.mxu0 %v925_v48  ;;  %952 = vmatpush3.bf16.msra.mxu1 %v949_v44  ;;  %v1254_v27 = vld [vmem:[#allocation2 + $0x8] sm:$0xff]  ;;  %v429_v29 = vld [vmem:[#allocation7 + $0x40] sm:$0xff]  ;;  %v977_v31 = vpack.c.bf16 %v437_v25, %v434_v24  ;;  %v436_v33 = vld [vmem:[#allocation7 + $0x78] sm:$0xff] }
  0x4e   :  { %954 = vmatprep.subr.bf16.mxu1 %v953_v53  ;;  %v433_v32 = vld [vmem:[#allocation7 + $0x60] sm:$0xff]  ;;  %v440_v34 = vld [vmem:[#allocation7 + $0x98] sm:$0xff]  ;;  %v443_v35 = vld [vmem:[#allocation7 + $0xb0] sm:$0xff]  ;;  %v1005_v36 = vpack.c.bf16 %v432_v30, %v429_v29 }
  0x4f   :  { %v1258_v37 = vld [vmem:[#allocation2 + $0x10] sm:$0xff]  ;;  %v979_v38 = vpack.c.bf16 %v436_v33, %v433_v32  ;;  %v438_v40 = vld [vmem:[#allocation7 + $0x88] sm:$0xff]  ;;  %v981_v42 = vpack.c.bf16 %v443_v35, %v440_v34  ;;  %v449_v46 = vld [vmem:[#allocation7 + $0xe0] sm:$0xff] }
  0x50   :  { %928 = vmatpush1.bf16.msra.mxu0 %v927_v54  ;;  %v435_v39 = vld [vmem:[#allocation7 + $0x70] sm:$0xff]  ;;  %v442_v44 = vld [vmem:[#allocation7 + $0xa8] sm:$0xff]  ;;  %v1264_v48 = vld [vmem:[#allocation2 + $0x18] sm:$0xff] }
  0x51   :  { %930 = vmatprep.subr.bf16.mxu0 %v929_v57  ;;  %956 = vmatpush3.bf16.msra.mxu1 %v953_v53  ;;  %v439_v43 = vld [vmem:[#allocation7 + $0x90] sm:$0xff]  ;;  %v446_v45 = vld [vmem:[#allocation7 + $0xc8] sm:$0xff]  ;;  %v1009_v47 = vpack.c.bf16 %v438_v40, %v435_v39  ;;  %v441_v50 = vld [vmem:[#allocation7 + $0xa0] sm:$0xff] }
  0x52   :  { %958 = vmatprep.subr.bf16.mxu1 %v957_v62  ;;  %v983_v49 = vpack.c.bf16 %v442_v44, %v439_v43  ;;  %v444_v51 = vld [vmem:[#allocation7 + $0xb8] sm:$0xff]  ;;  %v1266_v52 = vld [vmem:[#allocation2 + $0x20] sm:$0xff]  ;;  %v985_v53 = vpack.c.bf16 %v449_v46, %v446_v45  ;;  %v455_v57 = vld [vmem:[#allocation7 + $0x110] sm:$0xff] }
  0x53   :  { %v445_v54 = vld [vmem:[#allocation7 + $0xc0] sm:$0xff]  ;;  %v448_v55 = vld [vmem:[#allocation7 + $0xd8] sm:$0xff]  ;;  %v1013_v58 = vpack.c.bf16 %v444_v51, %v441_v50  ;;  %v1272_v60 = vld [vmem:[#allocation2 + $0x28] sm:$0xff] }
  0x54   :  { %932 = vmatpush1.bf16.msra.mxu0 %v931_v63  ;;  %v452_v56 = vld [vmem:[#allocation7 + $0xf8] sm:$0xff]  ;;  %v987_v59 = vpack.c.bf16 %v448_v55, %v445_v54  ;;  %v447_v61 = vld [vmem:[#allocation7 + $0xd0] sm:$0xff]  ;;  %v454_v2 = vld [vmem:[#allocation7 + $0x108] sm:$0xff] }
  0x55   :  { %934 = vmatprep.subr.bf16.mxu0 %v933_v3  ;;  %960 = vmatpush3.bf16.msra.mxu1 %v957_v62  ;;  %v450_v62 = vld [vmem:[#allocation7 + $0xe8] sm:$0xff]  ;;  %v989_v63 = vpack.c.bf16 %v455_v57, %v452_v56  ;;  %v451_v1 = vld [vmem:[#allocation7 + $0xf0] sm:$0xff]  ;;  %v461_v5 = vld [vmem:[#allocation7 + $0x140] sm:$0xff] }
  0x56   :  { %962 = vmatprep.subr.bf16.mxu1 %v961_v8  ;;  %v1274_v3 = vld [vmem:[#allocation2 + $0x30] sm:$0xff]  ;;  %v458_v4 = vld [vmem:[#allocation7 + $0x128] sm:$0xff]  ;;  %v1017_v6 = vpack.c.bf16 %v450_v62, %v447_v61  ;;  %v991_v7 = vpack.c.bf16 %v454_v2, %v451_v1  ;;  %v456_v10 = vld [vmem:[#allocation7 + $0x118] sm:$0xff] }
  0x57   :  { %v993_v11 = vpack.c.bf16 %v461_v5, %v458_v4  ;;  %v460_v13 = vld [vmem:[#allocation7 + $0x138] sm:$0xff]  ;;  %v467_v15 = vld [vmem:[#allocation7 + $0x170] sm:$0xff]  ;;  %v462_v19 = vld [vmem:[#allocation7 + $0x148] sm:$0xff] }
  0x58   :  { %936 = vmatpush1.bf16.msra.mxu0 %v935_v9  ;;  %v453_v9 = vld [vmem:[#allocation7 + $0x100] sm:$0xff]  ;;  %v464_v14 = vld [vmem:[#allocation7 + $0x158] sm:$0xff]  ;;  %v466_v22 = vld [vmem:[#allocation7 + $0x168] sm:$0xff] }
  0x59   :  { %970 = vmatprep.subr.bf16.mxu0 %v969_v12  ;;  %964 = vmatpush3.bf16.msra.mxu1 %v961_v8  ;;  %v1280_v8 = vld [vmem:[#allocation2 + $0x38] sm:$0xff]  ;;  %v457_v12 = vld [vmem:[#allocation7 + $0x120] sm:$0xff]  ;;  %v1021_v16 = vpack.c.bf16 %v456_v10, %v453_v9  ;;  %v997_v20 = vpack.c.bf16 %v467_v15, %v464_v14 }
  0x5a   :  { %966 = vmatprep.subr.bf16.mxu1 %v965_v17  ;;  %v465_v25 = vld [vmem:[#allocation7 + $0x160] sm:$0xff] }
  0x5b   :  { %203 = vmatmul.mubr.f32.vlgmr.msra.gmra.mrb[0].mxu0 %v1249_v41  ;;  %v73_v30 = vld [vmem:[%s1408_s3] sm:$0x7] }
  0x5c   :  { %972 = vmatpush1.bf16.msra.mxu0 %v971_v18  ;;  %208 = vmatprep.mubr.f32.mxu0 %v1168_v0  ;;  %v459_v18 = vld [vmem:[#allocation7 + $0x130] sm:$0xff] }
  0x5d   :  { %974 = vmatprep.subr.bf16.mxu0 %v973_v21  ;;  %968 = vmatpush3.bf16.msra.mxu1 %v965_v17  ;;  %v995_v17 = vpack.c.bf16 %v460_v13, %v457_v12  ;;  %v463_v21 = vld [vmem:[#allocation7 + $0x150] sm:$0xff]  ;;  %v1025_v23 = vpack.c.bf16 %v462_v19, %v459_v18 }
  0x5e   :  { %1002 = vmatprep.subr.bf16.mxu1 %v1001_v26  ;;  %v999_v24 = vpack.c.bf16 %v466_v22, %v463_v21 }
  0x5f   :  { %209 = vmatmul.mubr.f32.gmra.mrb[2].mxu0 %v1254_v27 }
  0x60   :  { %976 = vmatpush1.bf16.msra.mxu0 %v975_v28  ;;  %214 = vmatprep.mubr.f32.mxu0 %v1168_v0 }
  0x61   :  { %978 = vmatprep.subr.bf16.mxu0 %v977_v31  ;;  %850 = vmatmul.mubr.f32.vlgmr.msra.gmra.mrb[0].mxu1 %v1254_v27 }
  0x62   :  { %1004 = vmatpush3.bf16.msra.mxu1 %v1001_v26  ;;  %852 = vmatprep.mubr.f32.mxu1 %v1258_v37  ;;  %v468_v26 = vld [vmem:[#allocation7 + $0x178] sm:$0xff] }
  0x63   :  { %215 = vmatmul.mubr.f32.gmra.mrb[4].mxu0 %v1258_v37  ;;  %1006 = vmatprep.subr.bf16.mxu1 %v1005_v36  ;;  %v1029_v28 = vpack.c.bf16 %v468_v26, %v465_v25 }
  0x64   :  { %980 = vmatpush1.bf16.msra.mxu0 %v979_v38  ;;  %220 = vmatprep.mubr.f32.mxu0 %v1168_v0 }
  0x65   :  { %982 = vmatprep.subr.bf16.mxu0 %v981_v42  ;;  %853 = vmatmul.mubr.f32.gmra.mrb[2].mxu1 %v1264_v48 }
  0x66   :  { %1008 = vmatpush3.bf16.msra.mxu1 %v1005_v36  ;;  %855 = vmatprep.mubr.f32.mxu1 %v1266_v52 }
  0x67   :  { %221 = vmatmul.mubr.f32.gmra.mrb[6].mxu0 %v1264_v48  ;;  %1010 = vmatprep.subr.bf16.mxu1 %v1009_v47 }
  0x68   :  { %984 = vmatpush1.bf16.msra.mxu0 %v983_v49  ;;  %226 = vmatprep.mubr.f32.mxu0 %v1168_v0 }
  0x69   :  { %986 = vmatprep.subr.bf16.mxu0 %v985_v53  ;;  %856 = vmatmul.mubr.f32.gmra.mrb[4].mxu1 %v1272_v60 }
  0x6a   :  { %1012 = vmatpush3.bf16.msra.mxu1 %v1009_v47  ;;  %858 = vmatprep.mubr.f32.mxu1 %v1274_v3 }
  0x6b   :  { %227 = vmatmul.mubr.f32.gmra.mrb[8].mxu0 %v1266_v52  ;;  %1014 = vmatprep.subr.bf16.mxu1 %v1013_v58 }
  0x6c   :  { %988 = vmatpush1.bf16.msra.mxu0 %v987_v59  ;;  %232 = vmatprep.mubr.f32.mxu0 %v1168_v0 }
  0x6d   :  { %990 = vmatprep.subr.bf16.mxu0 %v989_v63  ;;  %859 = vmatmul.mubr.f32.gmra.mrb[6].mxu1 %v1280_v8 }
  0x6e   :  { %1016 = vmatpush3.bf16.msra.mxu1 %v1013_v58  ;;  %893 = vmatprep.mubr.f32.mxu1 %v1249_v41 }
  0x6f   :  { %233 = vmatmul.mubr.f32.gmra.mrb[10].mxu0 %v1272_v60  ;;  %1018 = vmatprep.subr.bf16.mxu1 %v1017_v6 }
  0x70   :  { %992 = vmatpush1.bf16.msra.mxu0 %v991_v7  ;;  %238 = vmatprep.mubr.f32.mxu0 %v1168_v0 }
  0x71   :  { %994 = vmatprep.subr.bf16.mxu0 %v993_v11 }
  0x72   :  { %1020 = vmatpush3.bf16.msra.mxu1 %v1017_v6 }
  0x73   :  { %239 = vmatmul.mubr.f32.gmra.mrb[12].mxu0 %v1274_v3  ;;  %1022 = vmatprep.subr.bf16.mxu1 %v1021_v16 }
  0x74   :  { %996 = vmatpush1.bf16.msra.mxu0 %v995_v17  ;;  %244 = vmatprep.mubr.f32.mxu0 %v1168_v0  ;;  %v404_v17 = vld [vmem:[%s1409_s4] sm:$0x7]  ;;  %s1109_s4 = scalar_lea.vmem %s741_s16, 3072 }
  0x75   :  { %998 = vmatprep.subr.bf16.mxu0 %v997_v20  ;;  %p1110_p10 = scmp.ne.s32.totalorder %s741_s16, %s1109_s4  ;;  %p1115_p12 = scmp.lt.s32.totalorder %s1109_s4, %s1109_s4 }
  0x76   :  { %1024 = vmatpush3.bf16.msra.mxu1 %v1021_v16 }
  0x77   :  { %245 = vmatmul.mubr.f32.gmra.mrb[14].mxu0 %v1280_v8  ;;  %1026 = vmatprep.subr.bf16.mxu1 %v1025_v23  ;;  %p1116_p13 = por %p1115_p12, %p1114_p11 }
  0x78   :  { %1000 = vmatpush1.bf16.msra.mxu0 %v999_v24  ;;  %533 = vmatprep.mubr.f32.mxu0 %v1168_v0 }
  0x79   :  { %p1117_p0 = pnand %p1116_p13, %p1110_p10 }
  0x7a   :  { %1028 = vmatpush3.bf16.msra.mxu1 %v1025_v23 }
  0x7b   :  { %534 = vmatmul.mubr.f32.vlgmr.msra.gmra.mrb[16].mxu0 %v1249_v41  ;;  %1030 = vmatprep.subr.bf16.mxu1 %v1029_v28  ;;  %v75_v41 = vlaneseq }
  0x7c   :  { %539 = vmatprep.mubr.f32.mxu0 %v1168_v0 }
  0x7e   :  { %1032 = vmatpush3.bf16.msra.mxu1 %v1029_v28 }
  0x7f   :  { %540 = vmatmul.mubr.f32.gmra.mrb[18].mxu0 %v1254_v27 }
  0x80   :  { %545 = vmatprep.mubr.f32.mxu0 %v1168_v0 }
  0x81   :  { %894 = vmatmul.mubr.f32.vlgmr.msra.gmra.mrb[8].mxu1 %v1254_v27  ;;  %v1312_v27 = vshrl.u32 %v75_v41, 7 }
  0x82   :  { %896 = vmatprep.mubr.f32.mxu1 %v1258_v37 }
  0x83   :  { %546 = vmatmul.mubr.f32.gmra.mrb[20].mxu0 %v1258_v37  ;;  %v77_v29 = vsub.s32 0, %v1312_v27  ;;  %v81_v31 = vsub.s32 1, %v1312_v27  ;;  %v85_v33 = vsub.s32 2, %v1312_v27 }
  0x84   :  { %551 = vmatprep.mubr.f32.mxu0 %v1168_v0 }
  0x85   :  { %897 = vmatmul.mubr.f32.gmra.mrb[10].mxu1 %v1264_v48  ;;  %v1321_v32 = vrot.slane %v73_v30, %v77_v29  ;;  %v86_v38 = vrot.slane %v73_v30, %v85_v33  ;;  %v1350_v21 = vrot.slane %v404_v17, %v77_v29  ;;  %v1355_v23 = vrot.slane %v404_v17, %v81_v31 }
  0x86   :  { %899 = vmatprep.mubr.f32.mxu1 %v1266_v52 }
  0x87   :  { %552 = vmatmul.mubr.f32.gmra.mrb[22].mxu0 %v1264_v48 }
  0x88   :  { %557 = vmatprep.mubr.f32.mxu0 %v1168_v0 }
  0x89   :  { %900 = vmatmul.mubr.f32.gmra.mrb[12].mxu1 %v1272_v60 }
  0x8a   :  { %902 = vmatprep.mubr.f32.mxu1 %v1274_v3 }
  0x8b   :  { %558 = vmatmul.mubr.f32.gmra.mrb[24].mxu0 %v1266_v52 }
  0x8c   :  { %563 = vmatprep.mubr.f32.mxu0 %v1168_v0 }
  0x8d   :  { %903 = vmatmul.mubr.f32.gmra.mrb[14].mxu1 %v1280_v8 }
  0x8f   :  { %564 = vmatmul.mubr.f32.gmra.mrb[26].mxu0 %v1272_v60 }
  0x90   :  { %569 = vmatprep.mubr.f32.mxu0 %v1168_v0 }
  0x93   :  { %570 = vmatmul.mubr.f32.gmra.mrb[28].mxu0 %v1274_v3 }
  0x94   :  { %575 = vmatprep.mubr.f32.mxu0 %v1168_v0  ;;  %v1325_v0 = vrot.slane %v73_v30, %v81_v31 }
  0x97   :  { %576 = vmatmul.mubr.f32.gmra.mrb[30].mxu0 %v1280_v8 }
 0x12e   :  { %v204_v34 = vpop.f32.mrb[0].mxu0 }
 0x12f   :  { %v356_v35 = vadd.f32 %v204_v34, %v1321_v32  ;;  %v206_v36 = vpop.f32.mrb[1].mxu0 }
 0x130   :  { %v357_v37 = vadd.f32 %v206_v36, %v1325_v0 }
 0x131   :  { %380 = vst [vmem:[#allocation8] sm:$0xff] %v356_v35 }
 0x132   :  { %381 = vst [vmem:[#allocation8 + $0x8] sm:$0xff] %v357_v37  ;;  %v210_v39 = vpop.f32.mrb[2].mxu0 }
 0x133   :  { %v359_v40 = vadd.f32 %v210_v39, %v1321_v32  ;;  %v212_v42 = vpop.f32.mrb[3].mxu0 }
 0x134   :  { %v360_v43 = vadd.f32 %v212_v42, %v1325_v0  ;;  %v851_v44 = vpop.f32.mrb[0].mxu1 }
 0x135   :  { %383 = vst [vmem:[#allocation8 + $0x18] sm:$0xff] %v359_v40  ;;  %v361_v45 = vadd.f32 %v851_v44, %v86_v38  ;;  %v317_v46 = vpop.f32.mrb[1].mxu1 }
 0x136   :  { %384 = vst [vmem:[#allocation8 + $0x20] sm:$0xff] %v360_v43  ;;  %v216_v47 = vpop.f32.mrb[4].mxu0  ;;  %v358_v48 = vadd.f32 %v317_v46, %v86_v38 }
 0x137   :  { %v362_v49 = vadd.f32 %v216_v47, %v1321_v32  ;;  %v218_v50 = vpop.f32.mrb[5].mxu0  ;;  %385 = vst [vmem:[#allocation8 + $0x28] sm:$0xff] %v361_v45 }
 0x138   :  { %v363_v51 = vadd.f32 %v218_v50, %v1325_v0  ;;  %382 = vst [vmem:[#allocation8 + $0x10] sm:$0xff] %v358_v48  ;;  %v854_v52 = vpop.f32.mrb[2].mxu1 }
 0x139   :  { %386 = vst [vmem:[#allocation8 + $0x30] sm:$0xff] %v362_v49  ;;  %v367_v53 = vadd.f32 %v854_v52, %v86_v38  ;;  %v327_v54 = vpop.f32.mrb[3].mxu1 }
 0x13a   :  { %387 = vst [vmem:[#allocation8 + $0x38] sm:$0xff] %v363_v51  ;;  %v222_v55 = vpop.f32.mrb[6].mxu0  ;;  %v364_v56 = vadd.f32 %v327_v54, %v86_v38 }
 0x13b   :  { %v365_v57 = vadd.f32 %v222_v55, %v1321_v32  ;;  %v224_v58 = vpop.f32.mrb[7].mxu0  ;;  %391 = vst [vmem:[#allocation8 + $0x58] sm:$0xff] %v367_v53 }
 0x13c   :  { %v366_v59 = vadd.f32 %v224_v58, %v1325_v0  ;;  %388 = vst [vmem:[#allocation8 + $0x40] sm:$0xff] %v364_v56  ;;  %v857_v60 = vpop.f32.mrb[4].mxu1 }
 0x13d   :  { %389 = vst [vmem:[#allocation8 + $0x48] sm:$0xff] %v365_v57  ;;  %v373_v61 = vadd.f32 %v857_v60, %v86_v38  ;;  %v337_v62 = vpop.f32.mrb[5].mxu1 }
 0x13e   :  { %390 = vst [vmem:[#allocation8 + $0x50] sm:$0xff] %v366_v59  ;;  %v228_v63 = vpop.f32.mrb[8].mxu0  ;;  %v370_v1 = vadd.f32 %v337_v62, %v86_v38 }
 0x13f   :  { %v368_v2 = vadd.f32 %v228_v63, %v1321_v32  ;;  %v230_v3 = vpop.f32.mrb[9].mxu0  ;;  %397 = vst [vmem:[#allocation8 + $0x88] sm:$0xff] %v373_v61 }
 0x140   :  { %v369_v4 = vadd.f32 %v230_v3, %v1325_v0  ;;  %394 = vst [vmem:[#allocation8 + $0x70] sm:$0xff] %v370_v1  ;;  %v860_v5 = vpop.f32.mrb[6].mxu1 }
 0x141   :  { %392 = vst [vmem:[#allocation8 + $0x60] sm:$0xff] %v368_v2  ;;  %v379_v6 = vadd.f32 %v860_v5, %v86_v38  ;;  %v347_v7 = vpop.f32.mrb[7].mxu1 }
 0x142   :  { %393 = vst [vmem:[#allocation8 + $0x68] sm:$0xff] %v369_v4  ;;  %v234_v8 = vpop.f32.mrb[10].mxu0  ;;  %v376_v9 = vadd.f32 %v347_v7, %v86_v38 }
 0x143   :  { %v371_v10 = vadd.f32 %v234_v8, %v1321_v32  ;;  %v236_v11 = vpop.f32.mrb[11].mxu0  ;;  %403 = vst [vmem:[#allocation8 + $0xb8] sm:$0xff] %v379_v6 }
 0x144   :  { %v372_v12 = vadd.f32 %v236_v11, %v1325_v0  ;;  %400 = vst [vmem:[#allocation8 + $0xa0] sm:$0xff] %v376_v9 }
 0x145   :  { %395 = vst [vmem:[#allocation8 + $0x78] sm:$0xff] %v371_v10 }
 0x146   :  { %396 = vst [vmem:[#allocation8 + $0x80] sm:$0xff] %v372_v12  ;;  %v240_v13 = vpop.f32.mrb[12].mxu0 }
 0x147   :  { %v374_v14 = vadd.f32 %v240_v13, %v1321_v32  ;;  %v242_v15 = vpop.f32.mrb[13].mxu0 }
 0x148   :  { %v375_v16 = vadd.f32 %v242_v15, %v1325_v0 }
 0x149   :  { %398 = vst [vmem:[#allocation8 + $0x90] sm:$0xff] %v374_v14 }
 0x14a   :  { %399 = vst [vmem:[#allocation8 + $0x98] sm:$0xff] %v375_v16  ;;  %v246_v18 = vpop.f32.mrb[14].mxu0 }
 0x14b   :  { %v377_v19 = vadd.f32 %v246_v18, %v1321_v32  ;;  %v248_v20 = vpop.f32.mrb[15].mxu0 }
 0x14c   :  { %v378_v22 = vadd.f32 %v248_v20, %v1325_v0 }
 0x14d   :  { %401 = vst [vmem:[#allocation8 + $0xa8] sm:$0xff] %v377_v19 }
 0x14e   :  { %402 = vst [vmem:[#allocation8 + $0xb0] sm:$0xff] %v378_v22  ;;  %v535_v24 = vpop.f32.mrb[16].mxu0 }
 0x14f   :  { %v687_v25 = vadd.f32 %v535_v24, %v1350_v21  ;;  %v537_v26 = vpop.f32.mrb[17].mxu0 }
 0x150   :  { %1120 = shalt.err (!%p1117_p0)
}
 0x151   :  { %s1121_s19 = scalar_lea.hbm %s1410_s5, 3072 }
 0x152   :  { %p1122_p1 = scmp.ne.s32.totalorder %s1410_s5, %s1121_s19  ;;  %p1125_p2 = scmp.lt.u32.totalorder %s1121_s19, %s1410_s5 }
 0x154   :  { %p1127_p3 = pnand %p1125_p2, %p1122_p1 }
 0x156   :  { %1130 = shalt.err (!%p1127_p3)
}
 0x157   :  { %746 = dma.vmem_to_hbm [thread:$0]  %s741_s16, 3072, %s1410_s5, [#allocation4], %s1162_s7, %s1162_s7, %s1163_s8   ;;  %v688_v28 = vadd.f32 %v537_v26, %v1355_v23  ;;  %711 = vst [vmem:[#allocation9] sm:$0xff] %v687_v25  ;;  %v417_v41 = vrot.slane %v404_v17, %v85_v33  ;;  %v541_v29 = vpop.f32.mrb[18].mxu0  ;;  %v895_v0 = vpop.f32.mrb[8].mxu1 }
 0x158   :  { %v690_v30 = vadd.f32 %v541_v29, %v1350_v21  ;;  %v543_v31 = vpop.f32.mrb[19].mxu0  ;;  %v648_v35 = vpop.f32.mrb[9].mxu1  ;;  %s1170_s5 = smov [#allocation9]  }
 0x159   :  { %712 = vst [vmem:[#allocation9 + $0x8] sm:$0xff] %v688_v28  ;;  %v691_v32 = vadd.f32 %v543_v31, %v1355_v23  ;;  %v692_v34 = vadd.f32 %v895_v0, %v417_v41  ;;  %v547_v36 = vpop.f32.mrb[20].mxu0  ;;  %v689_v37 = vadd.f32 %v648_v35, %v417_v41  ;;  %v898_v33 = vpop.f32.mrb[10].mxu1  ;;  %s752_s25 = sshll.u32 %s1170_s5, 4  ;;  %s753_s25 = int_to_ptr.vmem [resolvable:$true] %s752_s25 }
 0x15a   :  { %714 = vst [vmem:[#allocation9 + $0x18] sm:$0xff] %v690_v30  ;;  %v693_v38 = vadd.f32 %v547_v36, %v1350_v21  ;;  %v549_v39 = vpop.f32.mrb[21].mxu0  ;;  %v698_v40 = vadd.f32 %v898_v33, %v417_v41  ;;  %v658_v42 = vpop.f32.mrb[11].mxu1  ;;  %s1131_s26 = scalar_lea.vmem %s753_s25, 3072  ;;  %p1136_p5 = scmp.lt.s32.totalorder %s753_s25, %s753_s25 }
 0x15b   :  { %715 = vst [vmem:[#allocation9 + $0x20] sm:$0xff] %v691_v32  ;;  %716 = vst [vmem:[#allocation9 + $0x28] sm:$0xff] %v692_v34  ;;  %v694_v27 = vadd.f32 %v549_v39, %v1355_v23  ;;  %v553_v43 = vpop.f32.mrb[22].mxu0  ;;  %v695_v44 = vadd.f32 %v658_v42, %v417_v41  ;;  %p1132_p4 = scmp.ne.s32.totalorder %s753_s25, %s1131_s26  ;;  %p1137_p6 = scmp.lt.s32.totalorder %s1131_s26, %s1131_s26 }
 0x15c   :  { %713 = vst [vmem:[#allocation9 + $0x10] sm:$0xff] %v689_v37  ;;  %717 = vst [vmem:[#allocation9 + $0x30] sm:$0xff] %v693_v38  ;;  %v696_v45 = vadd.f32 %v553_v43, %v1350_v21  ;;  %v555_v46 = vpop.f32.mrb[23].mxu0  ;;  %v901_v48 = vpop.f32.mrb[12].mxu1 }
 0x15d   :  { %718 = vst [vmem:[#allocation9 + $0x38] sm:$0xff] %v694_v27  ;;  %722 = vst [vmem:[#allocation9 + $0x58] sm:$0xff] %v698_v40  ;;  %v697_v47 = vadd.f32 %v555_v46, %v1355_v23  ;;  %v704_v49 = vadd.f32 %v901_v48, %v417_v41  ;;  %v668_v50 = vpop.f32.mrb[13].mxu1  ;;  %p1138_p7 = por %p1137_p6, %p1136_p5 }
 0x15e   :  { %719 = vst [vmem:[#allocation9 + $0x40] sm:$0xff] %v695_v44  ;;  %720 = vst [vmem:[#allocation9 + $0x48] sm:$0xff] %v696_v45  ;;  %v559_v51 = vpop.f32.mrb[24].mxu0  ;;  %v701_v52 = vadd.f32 %v668_v50, %v417_v41 }
 0x15f   :  { %721 = vst [vmem:[#allocation9 + $0x50] sm:$0xff] %v697_v47  ;;  %v699_v53 = vadd.f32 %v559_v51, %v1350_v21  ;;  %v561_v54 = vpop.f32.mrb[25].mxu0  ;;  %728 = vst [vmem:[#allocation9 + $0x88] sm:$0xff] %v704_v49  ;;  %p1139_p8 = pnand %p1138_p7, %p1132_p4 }
 0x160   :  { %v700_v55 = vadd.f32 %v561_v54, %v1355_v23  ;;  %725 = vst [vmem:[#allocation9 + $0x70] sm:$0xff] %v701_v52  ;;  %v904_v56 = vpop.f32.mrb[14].mxu1 }
 0x161   :  { %723 = vst [vmem:[#allocation9 + $0x60] sm:$0xff] %v699_v53  ;;  %v710_v57 = vadd.f32 %v904_v56, %v417_v41  ;;  %v678_v58 = vpop.f32.mrb[15].mxu1 }
 0x162   :  { %724 = vst [vmem:[#allocation9 + $0x68] sm:$0xff] %v700_v55  ;;  %v565_v59 = vpop.f32.mrb[26].mxu0  ;;  %v707_v60 = vadd.f32 %v678_v58, %v417_v41 }
 0x163   :  { %v702_v61 = vadd.f32 %v565_v59, %v1350_v21  ;;  %v567_v62 = vpop.f32.mrb[27].mxu0  ;;  %734 = vst [vmem:[#allocation9 + $0xb8] sm:$0xff] %v710_v57 }
 0x164   :  { %v703_v63 = vadd.f32 %v567_v62, %v1355_v23  ;;  %731 = vst [vmem:[#allocation9 + $0xa0] sm:$0xff] %v707_v60 }
 0x165   :  { %726 = vst [vmem:[#allocation9 + $0x78] sm:$0xff] %v702_v61 }
 0x166   :  { %727 = vst [vmem:[#allocation9 + $0x80] sm:$0xff] %v703_v63  ;;  %v571_v1 = vpop.f32.mrb[28].mxu0 }
 0x167   :  { %v705_v2 = vadd.f32 %v571_v1, %v1350_v21  ;;  %v573_v3 = vpop.f32.mrb[29].mxu0 }
 0x168   :  { %v706_v4 = vadd.f32 %v573_v3, %v1355_v23 }
 0x169   :  { %729 = vst [vmem:[#allocation9 + $0x90] sm:$0xff] %v705_v2 }
 0x16a   :  { %730 = vst [vmem:[#allocation9 + $0x98] sm:$0xff] %v706_v4  ;;  %v577_v5 = vpop.f32.mrb[30].mxu0 }
 0x16b   :  { %v708_v6 = vadd.f32 %v577_v5, %v1350_v21  ;;  %v579_v7 = vpop.f32.mrb[31].mxu0 }
 0x16c   :  { %v709_v8 = vadd.f32 %v579_v7, %v1355_v23 }
 0x16d   :  { %732 = vst [vmem:[#allocation9 + $0xa8] sm:$0xff] %v708_v6 }
 0x16e   :  { %733 = vst [vmem:[#allocation9 + $0xb0] sm:$0xff] %v709_v8 }
 0x16f   :  { %1142 = shalt.err (!%p1139_p8)
}
 0x170   :  { %s1143_s29 = scalar_lea.hbm %s1411_s6, 3072 }
 0x171   :  { %p1144_p9 = scmp.ne.s32.totalorder %s1411_s6, %s1143_s29  ;;  %p1147_p10 = scmp.lt.u32.totalorder %s1143_s29, %s1411_s6 }
 0x173   :  { %p1149_p11 = pnand %p1147_p10, %p1144_p9 }
 0x175   :  { %1152 = shalt.err (!%p1149_p11)
}
 0x176   :  { %758 = dma.vmem_to_hbm [thread:$0]  %s753_s25, 3072, %s1411_s6, [#allocation10], %s1162_s7, %s1162_s7, %s1163_s8  }
 0x177   :  { %1157 = dma.done.wait [#allocation4], 3072  }
 0x178   :  { %1158 = vsyncadd [#allocation4], 4294964224 }
 0x179   :  { %1159 = dma.done.wait [#allocation10], 3072  }
 0x17a   :  { %1160 = vsyncadd [#allocation10], 4294964224 }
 0x17b   :  { %765 = vsyncpa [#allocation3], 1 }
 0x17c   :  { %766 = vsyncpa [#allocation6], 1 }
 0x17d   :  { %767 = vsyncpa [#allocation4], 1 }
 0x17e   :  { %768 = vsyncpa [#allocation10], 1 }

</bundles_post_ra>
